<compile_context>
chip_gen: v7x
topology: tpu7x:2x2x1
jax: 0.10.0
libtpu: 0.0.40
codegen_flags: <defaults>
</compile_context>

<pallas_src>
import numpy as np

import jax
import jax.numpy as jnp
from jax.experimental import pallas as pl
from jax.experimental.pallas import tpu as pltpu

_LANES = 128
_SUBLANES = 8
_TM_MAX = 512   # sweep point from the review: 128/256/512; 512 is safe here


def _round_up(v, m):
    return (v + m - 1) // m * m


def _make_kernel(num_gauss, neg_half_inv_sigma_sq, num_layers, compute_dtype):
    """Fused gaussian-RBF expansion + MLP (Linear+ReLU per layer)."""
    G = num_gauss
    cast = jnp.dtype(compute_dtype) != jnp.dtype(jnp.float32)

    def kernel(x_ref, mu_ref, *refs):
        out_ref = refs[-1]
        wb = refs[:-1]                        # (w0, b0, w1, b1, ...)

        x = x_ref[...]                        # (TM, NF) f32
        # Lane-dense gaussian expansion: one (TM, G*NF) slab, one subtract,
        # one square, one exp (EUP), one cast — then a single K=G*NF matmul.
        xt = jnp.concatenate([x] * G, axis=-1)            # (TM, G*NF)
        d = xt - mu_ref[...]                               # (1, G*NF) broadcast
        hexp = jnp.exp((d * d) * neg_half_inv_sigma_sq)    # f32
        lhs = hexp.astype(compute_dtype) if cast else hexp

        h = jnp.dot(lhs, wb[0][...], preferred_element_type=jnp.float32)
        h = jnp.maximum(h + wb[1][...], 0.0)

        # Remaining Linear + ReLU layers.
        for l in range(1, num_layers):
            w = wb[2 * l][...]
            b = wb[2 * l + 1][...]
            lhs_l = h.astype(compute_dtype) if cast else h
            h = jnp.maximum(
                jnp.dot(lhs_l, w, preferred_element_type=jnp.float32) + b, 0.0)

        out_ref[...] = h if h.dtype == out_ref.dtype else h.astype(out_ref.dtype)

    return kernel


def init_gaussian_embed_params(weights, biases, *, num_gauss, num_points, num_feats,
                               x_min, x_max, sigma, compute_dtype=jnp.bfloat16):
    """One-time (init-time) parameter preparation.

    weights[l]: (in_l, out_l) float32  (transpose of nn.Linear.weight)
    biases[l] : (out_l,)      float32
    """
    G = num_gauss
    NF = num_points * num_feats
    assert weights, "mlp_hid_dim must describe at least one Linear layer"
    assert weights[0].shape[0] == NF * G, "mlp_hid_dim[0] must equal N*F*num_gauss"

    padded_out = [_round_up(w.shape[1], _LANES) for w in weights]
    prepared = []

    # Layer 0: permute rows (nf*G + g) -> (g*NF + nf) so the kernel's lane-dense
    # expansion (G concatenated copies of the (TM, NF) tile) contracts against a
    # flat 2-D (G*NF, H1p) RHS in its natural (8,128)-tiled layout.
    w0 = jnp.asarray(weights[0], jnp.float32)
    h1, h1p = w0.shape[1], padded_out[0]
    w0r = w0.reshape(NF, G, h1).transpose(1, 0, 2).reshape(G * NF, h1)
    w0r = jnp.pad(w0r, ((0, 0), (0, h1p - h1))).astype(compute_dtype)
    b0 = jnp.pad(jnp.asarray(biases[0], jnp.float32), (0, h1p - h1))[None, :]
    prepared += [w0r, b0]

    for l in range(1, len(weights)):
        w = jnp.asarray(weights[l], jnp.float32)
        b = jnp.asarray(biases[l], jnp.float32)
        din, dout = w.shape
        din_p, dout_p = padded_out[l - 1], padded_out[l]
        wp = jnp.pad(w, ((0, din_p - din), (0, dout_p - dout))).astype(compute_dtype)
        bp = jnp.pad(b, (0, dout_p - dout))[None, :]
        prepared += [wp, bp]

    # Means in the same (g*NF + nf) lane order as the expansion / W0 rows.
    mu = jnp.asarray(
        np.repeat(np.linspace(x_min, x_max, G, dtype=np.float32), NF))[None, :]

    return {
        "wb": prepared,
        "mu": mu,
        "num_gauss": G,
        "neg_half_inv_sigma_sq": -1.0 / (2.0 * float(sigma) ** 2),
        "num_layers": len(weights),
        "out_dim": weights[-1].shape[1],
        "out_dim_padded": padded_out[-1],
        "nf": NF,
        "compute_dtype": compute_dtype,
    }


def gaussian_embed_forward(params, x, *, return_padded=False):
    """Per-step forward: x (B, N, F) float32 -> (B, out_dim) float32."""
    B, N, F = x.shape
    NF = N * F
    assert NF == params["nf"]

    x_flat = x.reshape(B, NF).astype(jnp.float32)        # contiguous collapse (free)

    # Row tile: >= 8 sublanes, <= _TM_MAX.  When the batch allows it, keep at
    # least two grid steps so v7x's second TensorCore has work ("parallel").
    TM = _round_up(max(B, _SUBLANES), _SUBLANES)
    if B > _SUBLANES:
        TM = min(TM, _round_up(pl.cdiv(B, 2), _SUBLANES))
    TM = min(TM, _TM_MAX)
    B_pad = _round_up(B, TM)
    if B_pad != B:
        x_flat = jnp.pad(x_flat, ((0, B_pad - B), (0, 0)))

    wb = params["wb"]
    mu = params["mu"]
    num_layers = params["num_layers"]
    out_p = params["out_dim_padded"]
    G = params["num_gauss"]

    kernel = _make_kernel(G, params["neg_half_inv_sigma_sq"],
                          num_layers, params["compute_dtype"])

    # Advisory cost estimate so XLA can schedule around this small call.
    h1p = wb[1].shape[1]
    flops = 2 * B_pad * (NF * G * h1p
                         + sum(wb[2 * l].shape[0] * wb[2 * l].shape[1]
                               for l in range(1, num_layers)))
    bytes_accessed = (x_flat.size * 4 + mu.size * 4
                      + sum(int(a.size) * a.dtype.itemsize for a in wb)
                      + B_pad * out_p * 4)
    cost = pl.CostEstimate(flops=int(flops),
                           transcendentals=int(B_pad * NF * G),
                           bytes_accessed=int(bytes_accessed))

    def call(single_buffer_weights):
        # x tiled over the M grid axis; means/weights/biases use constant
        # index_maps so they stay VMEM-resident across grid steps.
        in_specs = [pl.BlockSpec((TM, NF), lambda i: (i, 0))]
        for arr in (mu, *wb):
            kwargs = {}
            if single_buffer_weights:
                kwargs["pipeline_mode"] = pl.Buffered(1)   # no double-buffering
            in_specs.append(
                pl.BlockSpec(arr.shape,
                             (lambda i, _nd=arr.ndim: (0,) * _nd),
                             **kwargs))
        return pl.pallas_call(
            kernel,
            out_shape=jax.ShapeDtypeStruct((B_pad, out_p), jnp.float32),
            grid=(B_pad // TM,),
            in_specs=in_specs,
            out_specs=pl.BlockSpec((TM, out_p), lambda i: (i, 0)),
            compiler_params=pltpu.CompilerParams(
                dimension_semantics=("parallel",)),
            cost_estimate=cost,
        )(x_flat, mu, *wb)

    try:
        out = call(True)            # single-buffer the VMEM-resident operands
    except Exception:               # fallback for jax versions rejecting Buffered(1)
        out = call(False)

    if return_padded:
        return out
    if B_pad == B and out_p == params["out_dim"]:
        return out
    return out[:B, :params["out_dim"]]


def _reference_forward(x, weights, biases, *, num_gauss, x_min, x_max, sigma):
    """Pure-JAX f32 reference mirroring the PyTorch module exactly."""
    B, N, F = x.shape
    means = jnp.linspace(x_min, x_max, num_gauss, dtype=jnp.float32)
    xg = jnp.exp(-((x[..., None] - means) ** 2) / (2.0 * sigma ** 2))  # (B,N,F,G)
    h = xg.reshape(B, N * F * num_gauss)
    for w, b in zip(weights, biases):
        h = jnp.maximum(h @ w + b, 0.0)
    return h


if __name__ == "__main__":
    # Module hyper-parameters (small, self-consistent shapes).
    B, N, F = 2, 8, 4          # batch, num_points, num_feats
    num_gauss = 8
    x_min, x_max, sigma = 0.0, 5.0, 0.5
    nfg = N * F * num_gauss    # 256
    mlp_hid_dim = [nfg, 128, 64]

    key = jax.random.PRNGKey(0)
    k_x, k_w0, k_b0, k_w1, k_b1, k_x2 = jax.random.split(key, 6)

    x = jax.random.uniform(k_x, (B, N, F), dtype=jnp.float32,
                           minval=x_min, maxval=x_max)

    # Synthetic parameters (nn.Linear(in, out) -> W:(in,out), b:(out,)).
    weights = [
        0.05 * jax.random.normal(k_w0, (mlp_hid_dim[0], mlp_hid_dim[1]), jnp.float32),
        0.05 * jax.random.normal(k_w1, (mlp_hid_dim[1], mlp_hid_dim[2]), jnp.float32),
    ]
    biases = [
        0.01 * jax.random.normal(k_b0, (mlp_hid_dim[1],), jnp.float32),
        0.01 * jax.random.normal(k_b1, (mlp_hid_dim[2],), jnp.float32),
    ]

    ref = _reference_forward(x, weights, biases, num_gauss=num_gauss,
                             x_min=x_min, x_max=x_max, sigma=sigma)

    common = dict(num_gauss=num_gauss, num_points=N, num_feats=F,
                  x_min=x_min, x_max=x_max, sigma=sigma)

    # 1) f32-weight variant.  Tolerance covers TPU matmul-pass differences
    #    between XLA's and Mosaic's f32 dot (a structural bug would be ~0.1+).
    params_f32 = init_gaussian_embed_params(weights, biases,
                                            compute_dtype=jnp.float32, **common)
    out_f32 = jax.block_until_ready(gaussian_embed_forward(params_f32, x))
    assert out_f32.shape == (B, mlp_hid_dim[-1])
    assert jnp.allclose(out_f32, ref, atol=5e-3, rtol=5e-3), "f32 kernel mismatch"

    # 2) bf16-weight perf variant (v6e/v7x recommendation); f32 accumulation.
    params_bf16 = init_gaussian_embed_params(weights, biases,
                                             compute_dtype=jnp.bfloat16, **common)
    out_bf16 = jax.block_until_ready(gaussian_embed_forward(params_bf16, x))
    assert out_bf16.shape == (B, mlp_hid_dim[-1])
    assert jnp.allclose(out_bf16, ref, atol=1e-2, rtol=3e-2), "bf16 kernel mismatch"

    # 3) Larger, non-multiple batch: exercises batch padding + multi-step grid.
    B2 = 37
    x2 = jax.random.uniform(k_x2, (B2, N, F), dtype=jnp.float32,
                            minval=x_min, maxval=x_max)
    ref2 = _reference_forward(x2, weights, biases, num_gauss=num_gauss,
                              x_min=x_min, x_max=x_max, sigma=sigma)
    out2 = jax.block_until_ready(gaussian_embed_forward(params_f32, x2))
    assert out2.shape == (B2, mlp_hid_dim[-1])
    assert jnp.allclose(out2, ref2, atol=5e-3, rtol=5e-3), "multi-step grid mismatch"

    print("KERNEL_OK")
</pallas_src>

<mosaic_0001>
module attributes {stable_mosaic.version = 11 : i64} {
  func.func @kernel(%arg0: i32, %arg1: memref<8x32xf32, #tpu.memory_space<vmem>>, %arg2: memref<1x256xf32, #tpu.memory_space<vmem>>, %arg3: memref<256x128xf32, #tpu.memory_space<vmem>>, %arg4: memref<1x128xf32, #tpu.memory_space<vmem>>, %arg5: memref<128x128xf32, #tpu.memory_space<vmem>>, %arg6: memref<1x128xf32, #tpu.memory_space<vmem>>, %arg7: memref<8x128xf32, #tpu.memory_space<vmem>>) attributes {dimension_semantics = [#tpu.dimension_semantics<parallel>], iteration_bounds = array<i64: 1>, scalar_prefetch = 0 : i64, scratch_operands = 0 : i64, tpu.core_type = #tpu.core_type<tc>, window_params = [{transform_indices = @transform_0, window_bounds = array<i64: 8, 32>}, {pipeline_mode = #tpu.pipeline_mode<synchronous>, transform_indices = @transform_1, window_bounds = array<i64: 1, 256>}, {pipeline_mode = #tpu.pipeline_mode<synchronous>, transform_indices = @transform_2, window_bounds = array<i64: 256, 128>}, {pipeline_mode = #tpu.pipeline_mode<synchronous>, transform_indices = @transform_3, window_bounds = array<i64: 1, 128>}, {pipeline_mode = #tpu.pipeline_mode<synchronous>, transform_indices = @transform_4, window_bounds = array<i64: 128, 128>}, {pipeline_mode = #tpu.pipeline_mode<synchronous>, transform_indices = @transform_5, window_bounds = array<i64: 1, 128>}, {transform_indices = @transform_6, window_bounds = array<i64: 8, 128>}]} {
    %c0 = arith.constant 0 : index
    %c0_0 = arith.constant 0 : index
    %0 = vector.load %arg1[%c0, %c0_0] : memref<8x32xf32, #tpu.memory_space<vmem>>, vector<8x32xf32>
    %1 = tpu.concatenate %0, %0, %0, %0, %0, %0, %0, %0 in 1 : vector<8x32xf32>, vector<8x32xf32>, vector<8x32xf32>, vector<8x32xf32>, vector<8x32xf32>, vector<8x32xf32>, vector<8x32xf32>, vector<8x32xf32> -> vector<8x256xf32>
    %c0_1 = arith.constant 0 : index
    %c0_2 = arith.constant 0 : index
    %2 = vector.load %arg2[%c0_1, %c0_2] : memref<1x256xf32, #tpu.memory_space<vmem>>, vector<1x256xf32>
    %3 = vector.broadcast %2 : vector<1x256xf32> to vector<8x256xf32>
    %4 = arith.subf %1, %3 : vector<8x256xf32>
    %5 = arith.mulf %4, %4 : vector<8x256xf32>
    %cst = arith.constant -2.000000e+00 : f32
    %6 = vector.broadcast %cst : f32 to vector<8x256xf32>
    %7 = arith.mulf %5, %6 : vector<8x256xf32>
    %8 = math.exp %7 : vector<8x256xf32>
    %c0_3 = arith.constant 0 : index
    %c0_4 = arith.constant 0 : index
    %9 = vector.load %arg3[%c0_3, %c0_4] : memref<256x128xf32, #tpu.memory_space<vmem>>, vector<256x128xf32>
    %cst_5 = arith.constant dense<0.000000e+00> : vector<8x128xf32>
    %10 = tpu.matmul %8, %9, %cst_5 {dimension_numbers = #tpu.dot_dimension_numbers<[1], [0], [0], [1], [0, 0, 1, 1], [], []>} : vector<8x256xf32>, vector<256x128xf32>, vector<8x128xf32> -> vector<8x128xf32>
    %c0_6 = arith.constant 0 : index
    %c0_7 = arith.constant 0 : index
    %11 = vector.load %arg4[%c0_6, %c0_7] : memref<1x128xf32, #tpu.memory_space<vmem>>, vector<1x128xf32>
    %12 = vector.broadcast %11 : vector<1x128xf32> to vector<8x128xf32>
    %13 = arith.addf %10, %12 : vector<8x128xf32>
    %cst_8 = arith.constant 0.000000e+00 : f32
    %14 = vector.broadcast %cst_8 : f32 to vector<8x128xf32>
    %15 = arith.maximumf %13, %14 : vector<8x128xf32>
    %c0_9 = arith.constant 0 : index
    %c0_10 = arith.constant 0 : index
    %16 = vector.load %arg5[%c0_9, %c0_10] : memref<128x128xf32, #tpu.memory_space<vmem>>, vector<128x128xf32>
    %c0_11 = arith.constant 0 : index
    %c0_12 = arith.constant 0 : index
    %17 = vector.load %arg6[%c0_11, %c0_12] : memref<1x128xf32, #tpu.memory_space<vmem>>, vector<1x128xf32>
    %cst_13 = arith.constant dense<0.000000e+00> : vector<8x128xf32>
    %18 = tpu.matmul %15, %16, %cst_13 {dimension_numbers = #tpu.dot_dimension_numbers<[1], [0], [0], [1], [0, 0, 1, 1], [], []>} : vector<8x128xf32>, vector<128x128xf32>, vector<8x128xf32> -> vector<8x128xf32>
    %19 = vector.broadcast %17 : vector<1x128xf32> to vector<8x128xf32>
    %20 = arith.addf %18, %19 : vector<8x128xf32>
    %cst_14 = arith.constant 0.000000e+00 : f32
    %21 = vector.broadcast %cst_14 : f32 to vector<8x128xf32>
    %22 = arith.maximumf %20, %21 : vector<8x128xf32>
    %c0_15 = arith.constant 0 : index
    %c0_16 = arith.constant 0 : index
    %23 = vector.load %arg7[%c0_15, %c0_16] : memref<8x128xf32, #tpu.memory_space<vmem>>, vector<8x128xf32>
    tpu.vector_store %arg7[%c0_15, %c0_16], %22 {strides = array<i32>} : memref<8x128xf32, #tpu.memory_space<vmem>>, vector<8x128xf32>,
    return
  }
  func.func @transform_0(%arg0: i32) -> (i32, i32) {
    %c0_i32 = arith.constant 0 : i32
    %c0_i32_0 = arith.constant 0 : i32
    return %arg0, %c0_i32 : i32, i32
  }
  func.func @transform_1(%arg0: i32) -> (i32, i32) {
    %c0_i32 = arith.constant 0 : i32
    %c0_i32_0 = arith.constant 0 : i32
    %c0_i32_1 = arith.constant 0 : i32
    return %c0_i32, %c0_i32_0 : i32, i32
  }
  func.func @transform_2(%arg0: i32) -> (i32, i32) {
    %c0_i32 = arith.constant 0 : i32
    %c0_i32_0 = arith.constant 0 : i32
    %c0_i32_1 = arith.constant 0 : i32
    return %c0_i32, %c0_i32_0 : i32, i32
  }
  func.func @transform_3(%arg0: i32) -> (i32, i32) {
    %c0_i32 = arith.constant 0 : i32
    %c0_i32_0 = arith.constant 0 : i32
    %c0_i32_1 = arith.constant 0 : i32
    return %c0_i32, %c0_i32_0 : i32, i32
  }
  func.func @transform_4(%arg0: i32) -> (i32, i32) {
    %c0_i32 = arith.constant 0 : i32
    %c0_i32_0 = arith.constant 0 : i32
    %c0_i32_1 = arith.constant 0 : i32
    return %c0_i32, %c0_i32_0 : i32, i32
  }
  func.func @transform_5(%arg0: i32) -> (i32, i32) {
    %c0_i32 = arith.constant 0 : i32
    %c0_i32_0 = arith.constant 0 : i32
    %c0_i32_1 = arith.constant 0 : i32
    return %c0_i32, %c0_i32_0 : i32, i32
  }
  func.func @transform_6(%arg0: i32) -> (i32, i32) {
    %c0_i32 = arith.constant 0 : i32
    %c0_i32_0 = arith.constant 0 : i32
    return %arg0, %c0_i32 : i32, i32
  }
}

module attributes {stable_mosaic.version = 11 : i64} {
  func.func @kernel(%arg0: i32, %arg1: memref<8x32xf32, #tpu.memory_space<vmem>>, %arg2: memref<1x256xf32, #tpu.memory_space<vmem>>, %arg3: memref<256x128xf32, #tpu.memory_space<vmem>>, %arg4: memref<1x128xf32, #tpu.memory_space<vmem>>, %arg5: memref<128x128xf32, #tpu.memory_space<vmem>>, %arg6: memref<1x128xf32, #tpu.memory_space<vmem>>, %arg7: memref<8x128xf32, #tpu.memory_space<vmem>>) attributes {dimension_semantics = [#tpu.dimension_semantics<parallel>], iteration_bounds = array<i64: 1>, scalar_prefetch = 0 : i64, scratch_operands = 0 : i64, tpu.core_type = #tpu.core_type<tc>, window_params = [{transform_indices = @transform_0, window_bounds = array<i64: 8, 32>}, {pipeline_mode = #tpu.pipeline_mode<synchronous>, transform_indices = @transform_1, window_bounds = array<i64: 1, 256>}, {pipeline_mode = #tpu.pipeline_mode<synchronous>, transform_indices = @transform_2, window_bounds = array<i64: 256, 128>}, {pipeline_mode = #tpu.pipeline_mode<synchronous>, transform_indices = @transform_3, window_bounds = array<i64: 1, 128>}, {pipeline_mode = #tpu.pipeline_mode<synchronous>, transform_indices = @transform_4, window_bounds = array<i64: 128, 128>}, {pipeline_mode = #tpu.pipeline_mode<synchronous>, transform_indices = @transform_5, window_bounds = array<i64: 1, 128>}, {transform_indices = @transform_6, window_bounds = array<i64: 8, 128>}]} {
    %c0 = arith.constant 0 : index
    %c0_0 = arith.constant 0 : index
    %0 = vector.load %arg1[%c0, %c0_0] : memref<8x32xf32, #tpu.memory_space<vmem>>, vector<8x32xf32>
    %1 = tpu.concatenate %0, %0, %0, %0, %0, %0, %0, %0 in 1 : vector<8x32xf32>, vector<8x32xf32>, vector<8x32xf32>, vector<8x32xf32>, vector<8x32xf32>, vector<8x32xf32>, vector<8x32xf32>, vector<8x32xf32> -> vector<8x256xf32>
    %c0_1 = arith.constant 0 : index
    %c0_2 = arith.constant 0 : index
    %2 = vector.load %arg2[%c0_1, %c0_2] : memref<1x256xf32, #tpu.memory_space<vmem>>, vector<1x256xf32>
    %3 = vector.broadcast %2 : vector<1x256xf32> to vector<8x256xf32>
    %4 = arith.subf %1, %3 : vector<8x256xf32>
    %5 = arith.mulf %4, %4 : vector<8x256xf32>
    %cst = arith.constant -2.000000e+00 : f32
    %6 = vector.broadcast %cst : f32 to vector<8x256xf32>
    %7 = arith.mulf %5, %6 : vector<8x256xf32>
    %8 = math.exp %7 : vector<8x256xf32>
    %c0_3 = arith.constant 0 : index
    %c0_4 = arith.constant 0 : index
    %9 = vector.load %arg3[%c0_3, %c0_4] : memref<256x128xf32, #tpu.memory_space<vmem>>, vector<256x128xf32>
    %cst_5 = arith.constant dense<0.000000e+00> : vector<8x128xf32>
    %10 = tpu.matmul %8, %9, %cst_5 {dimension_numbers = #tpu.dot_dimension_numbers<[1], [0], [0], [1], [0, 0, 1, 1], [], []>} : vector<8x256xf32>, vector<256x128xf32>, vector<8x128xf32> -> vector<8x128xf32>
    %c0_6 = arith.constant 0 : index
    %c0_7 = arith.constant 0 : index
    %11 = vector.load %arg4[%c0_6, %c0_7] : memref<1x128xf32, #tpu.memory_space<vmem>>, vector<1x128xf32>
    %12 = vector.broadcast %11 : vector<1x128xf32> to vector<8x128xf32>
    %13 = arith.addf %10, %12 : vector<8x128xf32>
    %cst_8 = arith.constant 0.000000e+00 : f32
    %14 = vector.broadcast %cst_8 : f32 to vector<8x128xf32>
    %15 = arith.maximumf %13, %14 : vector<8x128xf32>
    %c0_9 = arith.constant 0 : index
    %c0_10 = arith.constant 0 : index
    %16 = vector.load %arg5[%c0_9, %c0_10] : memref<128x128xf32, #tpu.memory_space<vmem>>, vector<128x128xf32>
    %c0_11 = arith.constant 0 : index
    %c0_12 = arith.constant 0 : index
    %17 = vector.load %arg6[%c0_11, %c0_12] : memref<1x128xf32, #tpu.memory_space<vmem>>, vector<1x128xf32>
    %cst_13 = arith.constant dense<0.000000e+00> : vector<8x128xf32>
    %18 = tpu.matmul %15, %16, %cst_13 {dimension_numbers = #tpu.dot_dimension_numbers<[1], [0], [0], [1], [0, 0, 1, 1], [], []>} : vector<8x128xf32>, vector<128x128xf32>, vector<8x128xf32> -> vector<8x128xf32>
    %19 = vector.broadcast %17 : vector<1x128xf32> to vector<8x128xf32>
    %20 = arith.addf %18, %19 : vector<8x128xf32>
    %cst_14 = arith.constant 0.000000e+00 : f32
    %21 = vector.broadcast %cst_14 : f32 to vector<8x128xf32>
    %22 = arith.maximumf %20, %21 : vector<8x128xf32>
    %c0_15 = arith.constant 0 : index
    %c0_16 = arith.constant 0 : index
    %23 = vector.load %arg7[%c0_15, %c0_16] : memref<8x128xf32, #tpu.memory_space<vmem>>, vector<8x128xf32>
    tpu.vector_store %arg7[%c0_15, %c0_16], %22 {strides = array<i32>} : memref<8x128xf32, #tpu.memory_space<vmem>>, vector<8x128xf32>,
    return
  }
  func.func @transform_0(%arg0: i32) -> (i32, i32) {
    %c0_i32 = arith.constant 0 : i32
    %c0_i32_0 = arith.constant 0 : i32
    return %arg0, %c0_i32 : i32, i32
  }
  func.func @transform_1(%arg0: i32) -> (i32, i32) {
    %c0_i32 = arith.constant 0 : i32
    %c0_i32_0 = arith.constant 0 : i32
    %c0_i32_1 = arith.constant 0 : i32
    return %c0_i32, %c0_i32_0 : i32, i32
  }
  func.func @transform_2(%arg0: i32) -> (i32, i32) {
    %c0_i32 = arith.constant 0 : i32
    %c0_i32_0 = arith.constant 0 : i32
    %c0_i32_1 = arith.constant 0 : i32
    return %c0_i32, %c0_i32_0 : i32, i32
  }
  func.func @transform_3(%arg0: i32) -> (i32, i32) {
    %c0_i32 = arith.constant 0 : i32
    %c0_i32_0 = arith.constant 0 : i32
    %c0_i32_1 = arith.constant 0 : i32
    return %c0_i32, %c0_i32_0 : i32, i32
  }
  func.func @transform_4(%arg0: i32) -> (i32, i32) {
    %c0_i32 = arith.constant 0 : i32
    %c0_i32_0 = arith.constant 0 : i32
    %c0_i32_1 = arith.constant 0 : i32
    return %c0_i32, %c0_i32_0 : i32, i32
  }
  func.func @transform_5(%arg0: i32) -> (i32, i32) {
    %c0_i32 = arith.constant 0 : i32
    %c0_i32_0 = arith.constant 0 : i32
    %c0_i32_1 = arith.constant 0 : i32
    return %c0_i32, %c0_i32_0 : i32, i32
  }
  func.func @transform_6(%arg0: i32) -> (i32, i32) {
    %c0_i32 = arith.constant 0 : i32
    %c0_i32_0 = arith.constant 0 : i32
    return %arg0, %c0_i32 : i32, i32
  }
}

</mosaic_0001>

<bundles_post_ra>
// kernel: tpu_custom_call.1
= control target key start
LH: loop header
LB: loop body
LE: loop exit
PB: predicated region body
PF: predicated region fallthrough
CT: control target
= control target key end

     0   :  { %11 = vsyncpa [#allocation3], 0  ;;  %s702_s0 = inlined_call_operand.hbm [shape: f32[8,32], index: 0, kind: input, shape index: {}]   ;;  %s703_s1 = inlined_call_operand.vmem [shape: f32[1,256], index: 1, kind: input, shape index: {}]   ;;  %s704_s2 = inlined_call_operand.hbm [shape: f32[256,128], index: 2, kind: input, shape index: {}]   ;;  %s705_s3 = inlined_call_operand.vmem [shape: f32[1,128], index: 3, kind: input, shape index: {}]   ;;  %s706_s4 = inlined_call_operand.hbm [shape: f32[128,128], index: 4, kind: input, shape index: {}]   ;;  %s707_s5 = inlined_call_operand.vmem [shape: f32[1,128], index: 5, kind: input, shape index: {}]   ;;  %s708_s6 = inlined_call_operand.hbm [shape: f32[8,128], index: 6, kind: output, shape index: {}]  }
   0x1   :  { %12 = vsyncpa [#allocation6], 0 }
   0x2   :  { %13 = vsyncpa [#allocation4], 0  ;;  %s578_s21 = smov [#allocation5]   ;;  %s484_s25 = scalar_lea.hbm %s704_s2, 4096 }
   0x3   :  { %s31_s22 = sshll.u32 %s578_s21, 4  ;;  %p485_p0 = scmp.ne.s32.totalorder %s704_s2, %s484_s25  ;;  %s32_s22 = int_to_ptr.vmem [resolvable:$true] %s31_s22 }
   0x4   :  { %p488_p1 = scmp.lt.u32.totalorder %s484_s25, %s704_s2 }
   0x6   :  { %p490_p2 = pnand %p488_p1, %p485_p0 }
   0x8   :  { %493 = shalt.err (!%p490_p2)
}
   0x9   :  { %s494_s30 = scalar_lea.vmem %s32_s22, 4096  ;;  %p499_p4 = scmp.lt.s32.totalorder %s32_s22, %s32_s22 }
   0xa   :  { %p495_p3 = scmp.ne.s32.totalorder %s32_s22, %s494_s30  ;;  %p500_p5 = scmp.lt.s32.totalorder %s494_s30, %s494_s30 }
   0xc   :  { %p501_p6 = por %p500_p5, %p499_p4 }
   0xe   :  { %p502_p7 = pnand %p501_p6, %p495_p3 }
  0x10   :  { %505 = shalt.err (!%p502_p7)
}
  0x11   :  { %s579_s7 = smov 128   ;;  %s580_s8 = smov 8  }
  0x12   :  { %37 = dma.hbm_to_vmem [thread:$0]  %s704_s2, 4096, %s32_s22, [#allocation6], %s579_s7, %s579_s7, %s580_s8  }
  0x13   :  { %s581_s11 = smov [#allocation2]   ;;  %s582_s13 = smov [#allocation7]  }
  0x14   :  { %s20_s12 = sshll.u32 %s581_s11, 4  ;;  %s45_s14 = sshll.u32 %s582_s13, 4  ;;  %s21_s12 = int_to_ptr.vmem [resolvable:$true] %s20_s12  ;;  %s46_s14 = int_to_ptr.vmem [resolvable:$true] %s45_s14 }
  0x15   :  { %s506_s17 = scalar_lea.hbm %s702_s0, 128 }
  0x16   :  { %p507_p8 = scmp.ne.s32.totalorder %s702_s0, %s506_s17  ;;  %p510_p9 = scmp.lt.u32.totalorder %s506_s17, %s702_s0 }
  0x18   :  { %p512_p10 = pnand %p510_p9, %p507_p8 }
  0x1a   :  { %515 = shalt.err (!%p512_p10)
}
  0x1b   :  { %s516_s2 = scalar_lea.vmem %s21_s12, 128  ;;  %p521_p12 = scmp.lt.s32.totalorder %s21_s12, %s21_s12 }
  0x1c   :  { %p517_p11 = scmp.ne.s32.totalorder %s21_s12, %s516_s2  ;;  %p522_p13 = scmp.lt.s32.totalorder %s516_s2, %s516_s2 }
  0x1e   :  { %p523_p0 = por %p522_p13, %p521_p12 }
  0x20   :  { %p524_p1 = pnand %p523_p0, %p517_p11 }
  0x22   :  { %527 = shalt.err (!%p524_p1)
}
  0x23   :  { %23 = dma.hbm_to_vmem [thread:$0]  %s702_s0, 128, %s21_s12, [#allocation3]  }
  0x24   :  { %s528_s26 = scalar_lea.hbm %s706_s4, 2048 }
  0x25   :  { %p529_p2 = scmp.ne.s32.totalorder %s706_s4, %s528_s26  ;;  %p532_p3 = scmp.lt.u32.totalorder %s528_s26, %s706_s4 }
  0x27   :  { %p534_p4 = pnand %p532_p3, %p529_p2 }
  0x29   :  { %537 = shalt.err (!%p534_p4)
}
  0x2a   :  { %s538_s9 = scalar_lea.vmem %s46_s14, 2048  ;;  %p543_p6 = scmp.lt.s32.totalorder %s46_s14, %s46_s14 }
  0x2b   :  { %p539_p5 = scmp.ne.s32.totalorder %s46_s14, %s538_s9  ;;  %p544_p7 = scmp.lt.s32.totalorder %s538_s9, %s538_s9 }
  0x2d   :  { %p545_p8 = por %p544_p7, %p543_p6 }
  0x2f   :  { %p546_p9 = pnand %p545_p8, %p539_p5 }
  0x31   :  { %549 = shalt.err (!%p546_p9)
}
  0x32   :  { %51 = dma.hbm_to_vmem [thread:$0]  %s706_s4, 2048, %s46_s14, [#allocation6], %s579_s7, %s579_s7, %s580_s8  }
  0x33   :  { %572 = dma.done.wait [#allocation3], 128  }
  0x34   :  { %573 = vsyncadd [#allocation3], 4294967168 }
  0x35   :  { %574 = dma.done.wait [#allocation6], 6144  }
  0x36   :  { %575 = vsyncadd [#allocation6], 4294961152  ;;  %v667_v0 = vld [vmem:[#allocation2] sm:$0xff]  ;;  %v118_v1 = vld [vmem:[#allocation5 + $0x80] sm:$0xff]  ;;  %s583_s11 = smov 32   ;;  %s584_s12 = smov 96  }
  0x37   :  { %v119_v2 = vld [vmem:[#allocation5 + $0x88] sm:$0xff]  ;;  %65 = vrot.lane.b32.xlu0 %v667_v0, %s583_s11  ;;  %71 = vrot.lane.b32.xlu1 %v667_v0, %s584_s12  ;;  %v102_v4 = vld [vmem:[#allocation5] sm:$0xff]  ;;  %v120_v6 = vld [vmem:[#allocation5 + $0x90] sm:$0xff]  ;;  %s585_s4 = smov 64   ;;  %v586_v36 = vmov 0.0|0.0   ;;  %vm74_vm0 = vcmask 261120  }
  0x38   :  { %v412_v3 = vpack.c.bf16 %v119_v2, %v118_v1  ;;  %v103_v5 = vld [vmem:[#allocation5 + $0x8] sm:$0xff]  ;;  %v121_v8 = vld [vmem:[#allocation5 + $0x98] sm:$0xff]  ;;  %v104_v9 = vld [vmem:[#allocation5 + $0x10] sm:$0xff]  ;;  %444 = vmatprep.subr.bf16.mxu1 %v586_v36  ;;  %vm76_vm1 = vcmask 523264   ;;  %vm78_vm2 = vcmask 785408   ;;  %vm587_vm3 = vmmov 0  }
  0x39   :  { %v414_v7 = vpack.c.bf16 %v103_v5, %v102_v4  ;;  %v105_v10 = vld [vmem:[#allocation5 + $0x18] sm:$0xff]  ;;  %v416_v11 = vpack.c.bf16 %v121_v8, %v120_v6  ;;  %v122_v12 = vld [vmem:[#allocation5 + $0xa0] sm:$0xff]  ;;  %v123_v13 = vld [vmem:[#allocation5 + $0xa8] sm:$0xff]  ;;  %v82_v5 = vlaneseq  ;;  %s589_s16 = smov [#allocation8]  }
  0x3a   :  { %413 = vmatprep.subr.bf16.mxu0 %v412_v3  ;;  %v418_v14 = vpack.c.bf16 %v105_v10, %v104_v9  ;;  %v420_v15 = vpack.c.bf16 %v123_v13, %v122_v12  ;;  %v106_v16 = vld [vmem:[#allocation5 + $0x20] sm:$0xff]  ;;  %v107_v17 = vld [vmem:[#allocation5 + $0x28] sm:$0xff]  ;;  %v124_v18 = vld [vmem:[#allocation5 + $0xb0] sm:$0xff]  ;;  %s313_s17 = sshll.u32 %s589_s16, 4  ;;  %s314_s17 = int_to_ptr.vmem [resolvable:$true] %s313_s17 }
  0x3b   :  { %415 = vmatpush3.bf16.msra.mxu0 %v414_v7  ;;  %68 = vrot.lane.b32.xlu0 %v667_v0, %s585_s4  ;;  %v125_v19 = vld [vmem:[#allocation5 + $0xb8] sm:$0xff]  ;;  %v422_v20 = vpack.c.bf16 %v107_v17, %v106_v16  ;;  %v108_v22 = vld [vmem:[#allocation5 + $0x30] sm:$0xff]  ;;  %v126_v24 = vld [vmem:[#allocation5 + $0xc0] sm:$0xff]  ;;  %v83_v6 = vshrl.u32 %v82_v5, 7  ;;  %s550_s18 = scalar_lea.vmem %s314_s17, 128  ;;  %p555_p11 = scmp.lt.s32.totalorder %s314_s17, %s314_s17 }
  0x3c   :  { %417 = vmatprep.subr.bf16.mxu0 %v416_v11  ;;  %v424_v21 = vpack.c.bf16 %v125_v19, %v124_v18  ;;  %v109_v23 = vld [vmem:[#allocation5 + $0x38] sm:$0xff]  ;;  %v127_v25 = vld [vmem:[#allocation5 + $0xc8] sm:$0xff]  ;;  %v110_v28 = vld [vmem:[#allocation5 + $0x40] sm:$0xff]  ;;  %p551_p10 = scmp.ne.s32.totalorder %s314_s17, %s550_s18  ;;  %p556_p12 = scmp.lt.s32.totalorder %s550_s18, %s550_s18 }
  0x3d   :  { %v426_v26 = vpack.c.bf16 %v109_v23, %v108_v22  ;;  %v428_v27 = vpack.c.bf16 %v127_v25, %v126_v24  ;;  %v111_v29 = vld [vmem:[#allocation5 + $0x48] sm:$0xff]  ;;  %v128_v30 = vld [vmem:[#allocation5 + $0xd0] sm:$0xff]  ;;  %v129_v31 = vld [vmem:[#allocation5 + $0xd8] sm:$0xff]  ;;  %v84_v7 = vsub.s32 0, %v83_v6  ;;  %v88_v8 = vsub.s32 1, %v83_v6 }
  0x3e   :  { %v212_v32 = vld [vmem:[#allocation7] sm:$0xff]  ;;  %v213_v33 = vld [vmem:[#allocation7 + $0x8] sm:$0xff]  ;;  %v214_v34 = vld [vmem:[#allocation7 + $0x10] sm:$0xff]  ;;  %v430_v35 = vpack.c.bf16 %v111_v29, %v110_v28  ;;  %v432_v39 = vpack.c.bf16 %v129_v31, %v128_v30  ;;  %p557_p13 = por %p556_p12, %p555_p11 }
  0x3f   :  { %419 = vmatpush3.bf16.msra.mxu0 %v418_v14  ;;  %v445_v37 = vpack.c.bf16 %v213_v33, %v212_v32  ;;  %v215_v38 = vld [vmem:[#allocation7 + $0x18] sm:$0xff]  ;;  %v112_v40 = vld [vmem:[#allocation5 + $0x50] sm:$0xff]  ;;  %v130_v42 = vld [vmem:[#allocation5 + $0xe0] sm:$0xff]  ;;  %v588_v33 = vmov 0.0  }
  0x40   :  { %421 = vmatprep.subr.bf16.mxu0 %v420_v15  ;;  %v113_v41 = vld [vmem:[#allocation5 + $0x58] sm:$0xff]  ;;  %v131_v43 = vld [vmem:[#allocation5 + $0xe8] sm:$0xff]  ;;  %v448_v44 = vpack.c.bf16 %v215_v38, %v214_v34  ;;  %v216_v45 = vld [vmem:[#allocation7 + $0x20] sm:$0xff]  ;;  %409 = vmatprep.mubr.msk.f32.mxu1 %vm587_vm3, %v588_v33  ;;  %p558_p0 = pnand %p557_p13, %p551_p10 }
  0x41   :  { %446 = vmatpush3.bf16.msra.mxu1 %v445_v37  ;;  %v217_v46 = vld [vmem:[#allocation7 + $0x28] sm:$0xff]  ;;  %v434_v47 = vpack.c.bf16 %v113_v41, %v112_v40  ;;  %v436_v48 = vpack.c.bf16 %v131_v43, %v130_v42  ;;  %v114_v49 = vld [vmem:[#allocation5 + $0x60] sm:$0xff]  ;;  %v132_v51 = vld [vmem:[#allocation5 + $0xf0] sm:$0xff] }
  0x42   :  { %447 = vmatprep.subr.bf16.mxu1 %v586_v36  ;;  %v115_v50 = vld [vmem:[#allocation5 + $0x68] sm:$0xff]  ;;  %v133_v52 = vld [vmem:[#allocation5 + $0xf8] sm:$0xff]  ;;  %v451_v53 = vpack.c.bf16 %v217_v46, %v216_v45  ;;  %v218_v54 = vld [vmem:[#allocation7 + $0x30] sm:$0xff] }
  0x43   :  { %423 = vmatpush3.bf16.msra.mxu0 %v422_v20  ;;  %v219_v55 = vld [vmem:[#allocation7 + $0x38] sm:$0xff]  ;;  %v438_v56 = vpack.c.bf16 %v115_v50, %v114_v49  ;;  %v440_v57 = vpack.c.bf16 %v133_v52, %v132_v51  ;;  %v116_v58 = vld [vmem:[#allocation5 + $0x70] sm:$0xff]  ;;  %v220_v61 = vld [vmem:[#allocation7 + $0x40] sm:$0xff] }
  0x44   :  { %425 = vmatprep.subr.bf16.mxu0 %v424_v21  ;;  %v117_v59 = vld [vmem:[#allocation5 + $0x78] sm:$0xff]  ;;  %v454_v60 = vpack.c.bf16 %v219_v55, %v218_v54  ;;  %v221_v62 = vld [vmem:[#allocation7 + $0x48] sm:$0xff]  ;;  %v222_v2 = vld [vmem:[#allocation7 + $0x50] sm:$0xff] }
  0x45   :  { %449 = vmatpush3.bf16.msra.mxu1 %v448_v44  ;;  %v442_v63 = vpack.c.bf16 %v117_v59, %v116_v58  ;;  %v457_v1 = vpack.c.bf16 %v221_v62, %v220_v61  ;;  %v223_v3 = vld [vmem:[#allocation7 + $0x58] sm:$0xff]  ;;  %v224_v28 = vld [vmem:[#allocation7 + $0x60] sm:$0xff]  ;;  %v225_v29 = vld [vmem:[#allocation7 + $0x68] sm:$0xff] }
  0x46   :  { %450 = vmatprep.subr.bf16.mxu1 %v586_v36  ;;  %v460_v4 = vpack.c.bf16 %v223_v3, %v222_v2  ;;  %v80_v10 = vld [vmem:[%s703_s1] sm:$0x3]  ;;  %v226_v30 = vld [vmem:[#allocation7 + $0x70] sm:$0xff] }
  0x47   :  { %427 = vmatpush3.bf16.msra.mxu0 %v426_v26  ;;  %v85_v11 = vrot.slane %v80_v10, %v84_v7  ;;  %v89_v12 = vrot.slane %v80_v10, %v88_v8  ;;  %v227_v31 = vld [vmem:[#allocation7 + $0x78] sm:$0xff] }
  0x48   :  { %429 = vmatprep.subr.bf16.mxu0 %v428_v27  ;;  %v466_v32 = vpack.c.bf16 %v227_v31, %v226_v30 }
  0x49   :  { %452 = vmatpush3.bf16.msra.mxu1 %v451_v53 }
  0x4a   :  { %453 = vmatprep.subr.bf16.mxu1 %v586_v36 }
  0x4b   :  { %431 = vmatpush3.bf16.msra.mxu0 %v430_v35  ;;  %v323_v35 = vld [vmem:[%s705_s3] ss:$0 sm:$0xff] }
  0x4c   :  { %433 = vmatprep.subr.bf16.mxu0 %v432_v39 }
  0x4d   :  { %455 = vmatpush3.bf16.msra.mxu1 %v454_v60 }
  0x4e   :  { %456 = vmatprep.subr.bf16.mxu1 %v586_v36 }
  0x4f   :  { %435 = vmatpush3.bf16.msra.mxu0 %v434_v47 }
  0x50   :  { %437 = vmatprep.subr.bf16.mxu0 %v436_v48 }
  0x51   :  { %458 = vmatpush3.bf16.msra.mxu1 %v457_v1 }
  0x52   :  { %459 = vmatprep.subr.bf16.mxu1 %v586_v36 }
  0x53   :  { %439 = vmatpush3.bf16.msra.mxu0 %v438_v56 }
  0x54   :  { %441 = vmatprep.subr.bf16.mxu0 %v440_v57 }
  0x55   :  { %461 = vmatpush3.bf16.msra.mxu1 %v460_v4 }
  0x56   :  { %462 = vmatprep.subr.bf16.mxu1 %v586_v36 }
  0x57   :  { %443 = vmatpush3.bf16.msra.mxu0 %v442_v63 }
  0xa9   :  { %v66_v9 = vpop.permute.xlu0 %65  ;;  %v72_v13 = vpop.permute.xlu1 %71 }
  0xaa   :  { %v75_v14 = vsel %vm74_vm0, %v667_v0, %v66_v9  ;;  %v463_v0 = vpack.c.bf16 %v225_v29, %v224_v28 }
  0xac   :  { %464 = vmatpush3.bf16.msra.mxu1 %v463_v0 }
  0xad   :  { %v69_v15 = vpop.permute.xlu0 %68  ;;  %465 = vmatprep.subr.bf16.mxu1 %v586_v36  ;;  %v324_v36 = vld [vmem:[%s707_s5] ss:$0 sm:$0xff] }
  0xae   :  { %v77_v16 = vsel %vm76_vm1, %v75_v14, %v69_v15 }
  0xaf   :  { %v79_v17 = vsel %vm78_vm2, %v77_v16, %v72_v13 }
  0xb0   :  { %v92_v18 = vsub.f32 %v79_v17, %v85_v11  ;;  %v93_v19 = vsub.f32 %v79_v17, %v89_v12  ;;  %467 = vmatpush3.bf16.msra.mxu1 %v466_v32 }
  0xb2   :  { %v94_v20 = vmul.f32 %v92_v18, %v92_v18  ;;  %v95_v21 = vmul.f32 %v93_v19, %v93_v19 }
  0xb4   :  { %v96_v22 = vmul.f32 -2.0, %v94_v20  ;;  %v97_v23 = vmul.f32 -2.0, %v95_v21 }
  0xb6   :  { %v98_v24 = vmul.f32 1.442695, %v96_v22  ;;  %v100_v25 = vmul.f32 1.442695, %v97_v23 }
  0xb8   :  { %480 = vpow2.f32 %v98_v24 }
  0xb9   :  { %482 = vpow2.f32 %v100_v25 }
  0xc2   :  { %v481_v26 = vpop.eup %480 }
  0xc3   :  { %v483_v27 = vpop.eup %482 }
  0xc4   :  { %205 = vmatprep.mubr.f32.mxu0 %v483_v27 }
  0xc5   :  { %206 = vmatmul.mubr.f32.vlgmr.msra.gmra.mrb[0].mxu0 %v481_v26 }
 0x198   :  { %v357_v34 = vpop.f32.mrb[0].mxu0 }
 0x199   :  { %v358_v37 = vpop.f32.mrb[1].mxu0 }
 0x19a   :  { %v359_v38 = vadd.f32 %v358_v37, %v357_v34 }
 0x19c   :  { %v208_v39 = vadd.f32 %v359_v38, %v323_v35 }
 0x19e   :  { %v211_v40 = vmax.f32 %v208_v39, 0.0 }
 0x1a0   :  { %410 = vmatmul.mubr.f32.vlgmr.msra.gmra.mrb[0].mxu1 %v211_v40 }
 0x273   :  { %v301_v41 = vpop.f32.mrb[0].mxu1 }
 0x274   :  { %v302_v42 = vadd.f32 %v324_v36, %v301_v41  ;;  %v411_v43 = vpop.f32.mrb[1].mxu1 }
 0x276   :  { %v305_v44 = vmax.f32 %v302_v42, 0.0 }
 0x278   :  { %306 = vst [vmem:[#allocation8] sm:$0xff] %v305_v44 }
 0x279   :  { %561 = shalt.err (!%p558_p0)
}
 0x27a   :  { %s562_s20 = scalar_lea.hbm %s708_s6, 128 }
 0x27b   :  { %p563_p1 = scmp.ne.s32.totalorder %s708_s6, %s562_s20  ;;  %p566_p2 = scmp.lt.u32.totalorder %s562_s20, %s708_s6 }
 0x27d   :  { %p568_p3 = pnand %p566_p2, %p563_p1 }
 0x27f   :  { %571 = shalt.err (!%p568_p3)
}
 0x280   :  { %316 = dma.vmem_to_hbm [thread:$0]  %s314_s17, 128, %s708_s6, [#allocation4]  }
 0x281   :  { %576 = dma.done.wait [#allocation4], 128  }
 0x282   :  { %577 = vsyncadd [#allocation4], 4294967168 }
 0x283   :  { %320 = vsyncpa [#allocation3], 1 }
 0x284   :  { %321 = vsyncpa [#allocation6], 1 }
 0x285   :  { %322 = vsyncpa [#allocation4], 1 }

// kernel: tpu_custom_call.1
= control target key start
LH: loop header
LB: loop body
LE: loop exit
PB: predicated region body
PF: predicated region fallthrough
CT: control target
= control target key end

     0   :  { %11 = vsyncpa [#allocation3], 0  ;;  %s702_s0 = inlined_call_operand.hbm [shape: f32[8,32], index: 0, kind: input, shape index: {}]   ;;  %s703_s1 = inlined_call_operand.vmem [shape: f32[1,256], index: 1, kind: input, shape index: {}]   ;;  %s704_s2 = inlined_call_operand.hbm [shape: f32[256,128], index: 2, kind: input, shape index: {}]   ;;  %s705_s3 = inlined_call_operand.vmem [shape: f32[1,128], index: 3, kind: input, shape index: {}]   ;;  %s706_s4 = inlined_call_operand.hbm [shape: f32[128,128], index: 4, kind: input, shape index: {}]   ;;  %s707_s5 = inlined_call_operand.vmem [shape: f32[1,128], index: 5, kind: input, shape index: {}]   ;;  %s708_s6 = inlined_call_operand.hbm [shape: f32[8,128], index: 6, kind: output, shape index: {}]  }
   0x1   :  { %12 = vsyncpa [#allocation6], 0 }
   0x2   :  { %13 = vsyncpa [#allocation4], 0  ;;  %s578_s21 = smov [#allocation5]   ;;  %s484_s25 = scalar_lea.hbm %s704_s2, 4096 }
   0x3   :  { %s31_s22 = sshll.u32 %s578_s21, 4  ;;  %p485_p0 = scmp.ne.s32.totalorder %s704_s2, %s484_s25  ;;  %s32_s22 = int_to_ptr.vmem [resolvable:$true] %s31_s22 }
   0x4   :  { %p488_p1 = scmp.lt.u32.totalorder %s484_s25, %s704_s2 }
   0x6   :  { %p490_p2 = pnand %p488_p1, %p485_p0 }
   0x8   :  { %493 = shalt.err (!%p490_p2)
}
   0x9   :  { %s494_s30 = scalar_lea.vmem %s32_s22, 4096  ;;  %p499_p4 = scmp.lt.s32.totalorder %s32_s22, %s32_s22 }
   0xa   :  { %p495_p3 = scmp.ne.s32.totalorder %s32_s22, %s494_s30  ;;  %p500_p5 = scmp.lt.s32.totalorder %s494_s30, %s494_s30 }
   0xc   :  { %p501_p6 = por %p500_p5, %p499_p4 }
   0xe   :  { %p502_p7 = pnand %p501_p6, %p495_p3 }
  0x10   :  { %505 = shalt.err (!%p502_p7)
}
  0x11   :  { %s579_s7 = smov 128   ;;  %s580_s8 = smov 8  }
  0x12   :  { %37 = dma.hbm_to_vmem [thread:$0]  %s704_s2, 4096, %s32_s22, [#allocation6], %s579_s7, %s579_s7, %s580_s8  }
  0x13   :  { %s581_s11 = smov [#allocation2]   ;;  %s582_s13 = smov [#allocation7]  }
  0x14   :  { %s20_s12 = sshll.u32 %s581_s11, 4  ;;  %s45_s14 = sshll.u32 %s582_s13, 4  ;;  %s21_s12 = int_to_ptr.vmem [resolvable:$true] %s20_s12  ;;  %s46_s14 = int_to_ptr.vmem [resolvable:$true] %s45_s14 }
  0x15   :  { %s506_s17 = scalar_lea.hbm %s702_s0, 128 }
  0x16   :  { %p507_p8 = scmp.ne.s32.totalorder %s702_s0, %s506_s17  ;;  %p510_p9 = scmp.lt.u32.totalorder %s506_s17, %s702_s0 }
  0x18   :  { %p512_p10 = pnand %p510_p9, %p507_p8 }
  0x1a   :  { %515 = shalt.err (!%p512_p10)
}
  0x1b   :  { %s516_s2 = scalar_lea.vmem %s21_s12, 128  ;;  %p521_p12 = scmp.lt.s32.totalorder %s21_s12, %s21_s12 }
  0x1c   :  { %p517_p11 = scmp.ne.s32.totalorder %s21_s12, %s516_s2  ;;  %p522_p13 = scmp.lt.s32.totalorder %s516_s2, %s516_s2 }
  0x1e   :  { %p523_p0 = por %p522_p13, %p521_p12 }
  0x20   :  { %p524_p1 = pnand %p523_p0, %p517_p11 }
  0x22   :  { %527 = shalt.err (!%p524_p1)
}
  0x23   :  { %23 = dma.hbm_to_vmem [thread:$0]  %s702_s0, 128, %s21_s12, [#allocation3]  }
  0x24   :  { %s528_s26 = scalar_lea.hbm %s706_s4, 2048 }
  0x25   :  { %p529_p2 = scmp.ne.s32.totalorder %s706_s4, %s528_s26  ;;  %p532_p3 = scmp.lt.u32.totalorder %s528_s26, %s706_s4 }
  0x27   :  { %p534_p4 = pnand %p532_p3, %p529_p2 }
  0x29   :  { %537 = shalt.err (!%p534_p4)
}
  0x2a   :  { %s538_s9 = scalar_lea.vmem %s46_s14, 2048  ;;  %p543_p6 = scmp.lt.s32.totalorder %s46_s14, %s46_s14 }
  0x2b   :  { %p539_p5 = scmp.ne.s32.totalorder %s46_s14, %s538_s9  ;;  %p544_p7 = scmp.lt.s32.totalorder %s538_s9, %s538_s9 }
  0x2d   :  { %p545_p8 = por %p544_p7, %p543_p6 }
  0x2f   :  { %p546_p9 = pnand %p545_p8, %p539_p5 }
  0x31   :  { %549 = shalt.err (!%p546_p9)
}
  0x32   :  { %51 = dma.hbm_to_vmem [thread:$0]  %s706_s4, 2048, %s46_s14, [#allocation6], %s579_s7, %s579_s7, %s580_s8  }
  0x33   :  { %572 = dma.done.wait [#allocation3], 128  }
  0x34   :  { %573 = vsyncadd [#allocation3], 4294967168 }
  0x35   :  { %574 = dma.done.wait [#allocation6], 6144  }
  0x36   :  { %575 = vsyncadd [#allocation6], 4294961152  ;;  %v667_v0 = vld [vmem:[#allocation2] sm:$0xff]  ;;  %v118_v1 = vld [vmem:[#allocation5 + $0x80] sm:$0xff]  ;;  %s583_s11 = smov 32   ;;  %s584_s12 = smov 96  }
  0x37   :  { %v119_v2 = vld [vmem:[#allocation5 + $0x88] sm:$0xff]  ;;  %65 = vrot.lane.b32.xlu0 %v667_v0, %s583_s11  ;;  %71 = vrot.lane.b32.xlu1 %v667_v0, %s584_s12  ;;  %v102_v4 = vld [vmem:[#allocation5] sm:$0xff]  ;;  %v120_v6 = vld [vmem:[#allocation5 + $0x90] sm:$0xff]  ;;  %s585_s4 = smov 64   ;;  %v586_v36 = vmov 0.0|0.0   ;;  %vm74_vm0 = vcmask 261120  }
  0x38   :  { %v412_v3 = vpack.c.bf16 %v119_v2, %v118_v1  ;;  %v103_v5 = vld [vmem:[#allocation5 + $0x8] sm:$0xff]  ;;  %v121_v8 = vld [vmem:[#allocation5 + $0x98] sm:$0xff]  ;;  %v104_v9 = vld [vmem:[#allocation5 + $0x10] sm:$0xff]  ;;  %444 = vmatprep.subr.bf16.mxu1 %v586_v36  ;;  %vm76_vm1 = vcmask 523264   ;;  %vm78_vm2 = vcmask 785408   ;;  %vm587_vm3 = vmmov 0  }
  0x39   :  { %v414_v7 = vpack.c.bf16 %v103_v5, %v102_v4  ;;  %v105_v10 = vld [vmem:[#allocation5 + $0x18] sm:$0xff]  ;;  %v416_v11 = vpack.c.bf16 %v121_v8, %v120_v6  ;;  %v122_v12 = vld [vmem:[#allocation5 + $0xa0] sm:$0xff]  ;;  %v123_v13 = vld [vmem:[#allocation5 + $0xa8] sm:$0xff]  ;;  %v82_v5 = vlaneseq  ;;  %s589_s16 = smov [#allocation8]  }
  0x3a   :  { %413 = vmatprep.subr.bf16.mxu0 %v412_v3  ;;  %v418_v14 = vpack.c.bf16 %v105_v10, %v104_v9  ;;  %v420_v15 = vpack.c.bf16 %v123_v13, %v122_v12  ;;  %v106_v16 = vld [vmem:[#allocation5 + $0x20] sm:$0xff]  ;;  %v107_v17 = vld [vmem:[#allocation5 + $0x28] sm:$0xff]  ;;  %v124_v18 = vld [vmem:[#allocation5 + $0xb0] sm:$0xff]  ;;  %s313_s17 = sshll.u32 %s589_s16, 4  ;;  %s314_s17 = int_to_ptr.vmem [resolvable:$true] %s313_s17 }
  0x3b   :  { %415 = vmatpush3.bf16.msra.mxu0 %v414_v7  ;;  %68 = vrot.lane.b32.xlu0 %v667_v0, %s585_s4  ;;  %v125_v19 = vld [vmem:[#allocation5 + $0xb8] sm:$0xff]  ;;  %v422_v20 = vpack.c.bf16 %v107_v17, %v106_v16  ;;  %v108_v22 = vld [vmem:[#allocation5 + $0x30] sm:$0xff]  ;;  %v126_v24 = vld [vmem:[#allocation5 + $0xc0] sm:$0xff]  ;;  %v83_v6 = vshrl.u32 %v82_v5, 7  ;;  %s550_s18 = scalar_lea.vmem %s314_s17, 128  ;;  %p555_p11 = scmp.lt.s32.totalorder %s314_s17, %s314_s17 }
  0x3c   :  { %417 = vmatprep.subr.bf16.mxu0 %v416_v11  ;;  %v424_v21 = vpack.c.bf16 %v125_v19, %v124_v18  ;;  %v109_v23 = vld [vmem:[#allocation5 + $0x38] sm:$0xff]  ;;  %v127_v25 = vld [vmem:[#allocation5 + $0xc8] sm:$0xff]  ;;  %v110_v28 = vld [vmem:[#allocation5 + $0x40] sm:$0xff]  ;;  %p551_p10 = scmp.ne.s32.totalorder %s314_s17, %s550_s18  ;;  %p556_p12 = scmp.lt.s32.totalorder %s550_s18, %s550_s18 }
  0x3d   :  { %v426_v26 = vpack.c.bf16 %v109_v23, %v108_v22  ;;  %v428_v27 = vpack.c.bf16 %v127_v25, %v126_v24  ;;  %v111_v29 = vld [vmem:[#allocation5 + $0x48] sm:$0xff]  ;;  %v128_v30 = vld [vmem:[#allocation5 + $0xd0] sm:$0xff]  ;;  %v129_v31 = vld [vmem:[#allocation5 + $0xd8] sm:$0xff]  ;;  %v84_v7 = vsub.s32 0, %v83_v6  ;;  %v88_v8 = vsub.s32 1, %v83_v6 }
  0x3e   :  { %v212_v32 = vld [vmem:[#allocation7] sm:$0xff]  ;;  %v213_v33 = vld [vmem:[#allocation7 + $0x8] sm:$0xff]  ;;  %v214_v34 = vld [vmem:[#allocation7 + $0x10] sm:$0xff]  ;;  %v430_v35 = vpack.c.bf16 %v111_v29, %v110_v28  ;;  %v432_v39 = vpack.c.bf16 %v129_v31, %v128_v30  ;;  %p557_p13 = por %p556_p12, %p555_p11 }
  0x3f   :  { %419 = vmatpush3.bf16.msra.mxu0 %v418_v14  ;;  %v445_v37 = vpack.c.bf16 %v213_v33, %v212_v32  ;;  %v215_v38 = vld [vmem:[#allocation7 + $0x18] sm:$0xff]  ;;  %v112_v40 = vld [vmem:[#allocation5 + $0x50] sm:$0xff]  ;;  %v130_v42 = vld [vmem:[#allocation5 + $0xe0] sm:$0xff]  ;;  %v588_v33 = vmov 0.0  }
  0x40   :  { %421 = vmatprep.subr.bf16.mxu0 %v420_v15  ;;  %v113_v41 = vld [vmem:[#allocation5 + $0x58] sm:$0xff]  ;;  %v131_v43 = vld [vmem:[#allocation5 + $0xe8] sm:$0xff]  ;;  %v448_v44 = vpack.c.bf16 %v215_v38, %v214_v34  ;;  %v216_v45 = vld [vmem:[#allocation7 + $0x20] sm:$0xff]  ;;  %409 = vmatprep.mubr.msk.f32.mxu1 %vm587_vm3, %v588_v33  ;;  %p558_p0 = pnand %p557_p13, %p551_p10 }
  0x41   :  { %446 = vmatpush3.bf16.msra.mxu1 %v445_v37  ;;  %v217_v46 = vld [vmem:[#allocation7 + $0x28] sm:$0xff]  ;;  %v434_v47 = vpack.c.bf16 %v113_v41, %v112_v40  ;;  %v436_v48 = vpack.c.bf16 %v131_v43, %v130_v42  ;;  %v114_v49 = vld [vmem:[#allocation5 + $0x60] sm:$0xff]  ;;  %v132_v51 = vld [vmem:[#allocation5 + $0xf0] sm:$0xff] }
  0x42   :  { %447 = vmatprep.subr.bf16.mxu1 %v586_v36  ;;  %v115_v50 = vld [vmem:[#allocation5 + $0x68] sm:$0xff]  ;;  %v133_v52 = vld [vmem:[#allocation5 + $0xf8] sm:$0xff]  ;;  %v451_v53 = vpack.c.bf16 %v217_v46, %v216_v45  ;;  %v218_v54 = vld [vmem:[#allocation7 + $0x30] sm:$0xff] }
  0x43   :  { %423 = vmatpush3.bf16.msra.mxu0 %v422_v20  ;;  %v219_v55 = vld [vmem:[#allocation7 + $0x38] sm:$0xff]  ;;  %v438_v56 = vpack.c.bf16 %v115_v50, %v114_v49  ;;  %v440_v57 = vpack.c.bf16 %v133_v52, %v132_v51  ;;  %v116_v58 = vld [vmem:[#allocation5 + $0x70] sm:$0xff]  ;;  %v220_v61 = vld [vmem:[#allocation7 + $0x40] sm:$0xff] }
  0x44   :  { %425 = vmatprep.subr.bf16.mxu0 %v424_v21  ;;  %v117_v59 = vld [vmem:[#allocation5 + $0x78] sm:$0xff]  ;;  %v454_v60 = vpack.c.bf16 %v219_v55, %v218_v54  ;;  %v221_v62 = vld [vmem:[#allocation7 + $0x48] sm:$0xff]  ;;  %v222_v2 = vld [vmem:[#allocation7 + $0x50] sm:$0xff] }
  0x45   :  { %449 = vmatpush3.bf16.msra.mxu1 %v448_v44  ;;  %v442_v63 = vpack.c.bf16 %v117_v59, %v116_v58  ;;  %v457_v1 = vpack.c.bf16 %v221_v62, %v220_v61  ;;  %v223_v3 = vld [vmem:[#allocation7 + $0x58] sm:$0xff]  ;;  %v224_v28 = vld [vmem:[#allocation7 + $0x60] sm:$0xff]  ;;  %v225_v29 = vld [vmem:[#allocation7 + $0x68] sm:$0xff] }
  0x46   :  { %450 = vmatprep.subr.bf16.mxu1 %v586_v36  ;;  %v460_v4 = vpack.c.bf16 %v223_v3, %v222_v2  ;;  %v80_v10 = vld [vmem:[%s703_s1] sm:$0x3]  ;;  %v226_v30 = vld [vmem:[#allocation7 + $0x70] sm:$0xff] }
  0x47   :  { %427 = vmatpush3.bf16.msra.mxu0 %v426_v26  ;;  %v85_v11 = vrot.slane %v80_v10, %v84_v7  ;;  %v89_v12 = vrot.slane %v80_v10, %v88_v8  ;;  %v227_v31 = vld [vmem:[#allocation7 + $0x78] sm:$0xff] }
  0x48   :  { %429 = vmatprep.subr.bf16.mxu0 %v428_v27  ;;  %v466_v32 = vpack.c.bf16 %v227_v31, %v226_v30 }
  0x49   :  { %452 = vmatpush3.bf16.msra.mxu1 %v451_v53 }
  0x4a   :  { %453 = vmatprep.subr.bf16.mxu1 %v586_v36 }
  0x4b   :  { %431 = vmatpush3.bf16.msra.mxu0 %v430_v35  ;;  %v323_v35 = vld [vmem:[%s705_s3] ss:$0 sm:$0xff] }
  0x4c   :  { %433 = vmatprep.subr.bf16.mxu0 %v432_v39 }
  0x4d   :  { %455 = vmatpush3.bf16.msra.mxu1 %v454_v60 }
  0x4e   :  { %456 = vmatprep.subr.bf16.mxu1 %v586_v36 }
  0x4f   :  { %435 = vmatpush3.bf16.msra.mxu0 %v434_v47 }
  0x50   :  { %437 = vmatprep.subr.bf16.mxu0 %v436_v48 }
  0x51   :  { %458 = vmatpush3.bf16.msra.mxu1 %v457_v1 }
  0x52   :  { %459 = vmatprep.subr.bf16.mxu1 %v586_v36 }
  0x53   :  { %439 = vmatpush3.bf16.msra.mxu0 %v438_v56 }
  0x54   :  { %441 = vmatprep.subr.bf16.mxu0 %v440_v57 }
  0x55   :  { %461 = vmatpush3.bf16.msra.mxu1 %v460_v4 }
  0x56   :  { %462 = vmatprep.subr.bf16.mxu1 %v586_v36 }
  0x57   :  { %443 = vmatpush3.bf16.msra.mxu0 %v442_v63 }
  0xa9   :  { %v66_v9 = vpop.permute.xlu0 %65  ;;  %v72_v13 = vpop.permute.xlu1 %71 }
  0xaa   :  { %v75_v14 = vsel %vm74_vm0, %v667_v0, %v66_v9  ;;  %v463_v0 = vpack.c.bf16 %v225_v29, %v224_v28 }
  0xac   :  { %464 = vmatpush3.bf16.msra.mxu1 %v463_v0 }
  0xad   :  { %v69_v15 = vpop.permute.xlu0 %68  ;;  %465 = vmatprep.subr.bf16.mxu1 %v586_v36  ;;  %v324_v36 = vld [vmem:[%s707_s5] ss:$0 sm:$0xff] }
  0xae   :  { %v77_v16 = vsel %vm76_vm1, %v75_v14, %v69_v15 }
  0xaf   :  { %v79_v17 = vsel %vm78_vm2, %v77_v16, %v72_v13 }
  0xb0   :  { %v92_v18 = vsub.f32 %v79_v17, %v85_v11  ;;  %v93_v19 = vsub.f32 %v79_v17, %v89_v12  ;;  %467 = vmatpush3.bf16.msra.mxu1 %v466_v32 }
  0xb2   :  { %v94_v20 = vmul.f32 %v92_v18, %v92_v18  ;;  %v95_v21 = vmul.f32 %v93_v19, %v93_v19 }
  0xb4   :  { %v96_v22 = vmul.f32 -2.0, %v94_v20  ;;  %v97_v23 = vmul.f32 -2.0, %v95_v21 }
  0xb6   :  { %v98_v24 = vmul.f32 1.442695, %v96_v22  ;;  %v100_v25 = vmul.f32 1.442695, %v97_v23 }
  0xb8   :  { %480 = vpow2.f32 %v98_v24 }
  0xb9   :  { %482 = vpow2.f32 %v100_v25 }
  0xc2   :  { %v481_v26 = vpop.eup %480 }
  0xc3   :  { %v483_v27 = vpop.eup %482 }
  0xc4   :  { %205 = vmatprep.mubr.f32.mxu0 %v483_v27 }
  0xc5   :  { %206 = vmatmul.mubr.f32.vlgmr.msra.gmra.mrb[0].mxu0 %v481_v26 }
 0x198   :  { %v357_v34 = vpop.f32.mrb[0].mxu0 }
 0x199   :  { %v358_v37 = vpop.f32.mrb[1].mxu0 }
 0x19a   :  { %v359_v38 = vadd.f32 %v358_v37, %v357_v34 }
 0x19c   :  { %v208_v39 = vadd.f32 %v359_v38, %v323_v35 }
 0x19e   :  { %v211_v40 = vmax.f32 %v208_v39, 0.0 }
 0x1a0   :  { %410 = vmatmul.mubr.f32.vlgmr.msra.gmra.mrb[0].mxu1 %v211_v40 }
 0x273   :  { %v301_v41 = vpop.f32.mrb[0].mxu1 }
 0x274   :  { %v302_v42 = vadd.f32 %v324_v36, %v301_v41  ;;  %v411_v43 = vpop.f32.mrb[1].mxu1 }
 0x276   :  { %v305_v44 = vmax.f32 %v302_v42, 0.0 }
 0x278   :  { %306 = vst [vmem:[#allocation8] sm:$0xff] %v305_v44 }
 0x279   :  { %561 = shalt.err (!%p558_p0)
}
 0x27a   :  { %s562_s20 = scalar_lea.hbm %s708_s6, 128 }
 0x27b   :  { %p563_p1 = scmp.ne.s32.totalorder %s708_s6, %s562_s20  ;;  %p566_p2 = scmp.lt.u32.totalorder %s562_s20, %s708_s6 }
 0x27d   :  { %p568_p3 = pnand %p566_p2, %p563_p1 }
 0x27f   :  { %571 = shalt.err (!%p568_p3)
}
 0x280   :  { %316 = dma.vmem_to_hbm [thread:$0]  %s314_s17, 128, %s708_s6, [#allocation4]  }
 0x281   :  { %576 = dma.done.wait [#allocation4], 128  }
 0x282   :  { %577 = vsyncadd [#allocation4], 4294967168 }
 0x283   :  { %320 = vsyncpa [#allocation3], 1 }
 0x284   :  { %321 = vsyncpa [#allocation6], 1 }
 0x285   :  { %322 = vsyncpa [#allocation4], 1 }

</bundles_post_ra>
